<compile_context>
chip_gen: v7x
topology: tpu7x:2x2x1
jax: 0.10.0
libtpu: 0.0.40
codegen_flags: <defaults>
</compile_context>

<pallas_src>
import jax
import jax.numpy as jnp
from jax.experimental import pallas as pl
from jax.experimental.pallas import tpu as pltpu


def _round_up(x, m):
    return (x + m - 1) // m * m


def _cdiv(a, b):
    return (a + b - 1) // b


def _vmem_capacity_bytes():
    try:
        info = pltpu.get_tpu_info()
        cap = getattr(info, "vmem_capacity_bytes", None)
        if cap:
            return int(cap)
    except Exception:
        pass
    return 64 << 20          # conservative fallback (v7x per-TensorCore)


def _default_vmem_budget():
    # ~65% of per-core VMEM, capped: ~41 MiB on v7x (64 MiB), ~83 MiB on v5e/v6e.
    return min(int(_vmem_capacity_bytes() * 0.65), 96 << 20)


# ---------------------------------------------------------------------------
# Kernels
# ---------------------------------------------------------------------------
def _kernel_resident(x_ref, w1_ref, b1_ref, w2_ref, b2_ref, o_ref):
    """grid=(batch_tiles,): W1/W2 resident, out = relu(x@W1+b1)@W2+b2."""
    h = jnp.dot(x_ref[...], w1_ref[...], preferred_element_type=jnp.float32)
    h = jnp.maximum(h + b1_ref[...], 0.0).astype(w2_ref.dtype)
    out = jnp.dot(h, w2_ref[...], preferred_element_type=jnp.float32)
    o_ref[...] = (out + b2_ref[...]).astype(o_ref.dtype)


def _kernel_ktiled(x_ref, w1_ref, b1_ref, w2_ref, b2_ref, o_ref, acc_ref):
    """grid=(batch_tiles, K slabs): accumulate x@W1 over K in an f32 scratch."""
    k = pl.program_id(1)
    part = jnp.dot(x_ref[...], w1_ref[...], preferred_element_type=jnp.float32)

    @pl.when(k == 0)
    def _():
        acc_ref[...] = part          # direct store: no zero-init + add pass

    @pl.when(k > 0)
    def _():
        acc_ref[...] += part

    @pl.when(k == pl.num_programs(1) - 1)
    def _():
        # TODO(synk): chunk this epilogue over hidden columns (fori_loop,
        # unroll=True) to overlap the VPU ReLU/cast with the second matmul.
        h = jnp.maximum(acc_ref[...] + b1_ref[...], 0.0).astype(w2_ref.dtype)
        out = jnp.dot(h, w2_ref[...], preferred_element_type=jnp.float32)
        o_ref[...] = (out + b2_ref[...]).astype(o_ref.dtype)


# ---------------------------------------------------------------------------
# Wrapper
# ---------------------------------------------------------------------------
def base_forward(x, w1, b1, w2, b2, *,
                 batch_tile_target=256, k_tile_target=512,
                 compute_dtype=jnp.bfloat16, vmem_budget_bytes=None,
                 force_k_split=False):
    """Fused forward of Base: embed(relu(mlp(x)))."""
    B, in_f = x.shape
    in_f_w, hidden = w1.shape
    hidden_w, embed = w2.shape
    assert in_f == in_f_w and hidden == hidden_w
    b1 = b1.reshape(1, hidden)
    b2 = b2.reshape(1, embed)

    out_dtype = x.dtype
    csz = jnp.dtype(compute_dtype).itemsize
    osz = jnp.dtype(out_dtype).itemsize
    cap = _vmem_capacity_bytes()
    budget = (vmem_budget_bytes if vmem_budget_bytes is not None
              else _default_vmem_budget())

    # ---- lane-dense padded feature dims ------------------------------------
    in_p = _round_up(in_f, 128)
    hid_p = _round_up(hidden, 128)
    emb_p = _round_up(embed, 128)          # lane-dense output -> unmasked vst

    # ---- batch tiling: minimal padding, >=2 tiles for v7x megacore ---------
    B_p8 = _round_up(B, 8)
    if B_p8 >= 16:
        n_bt = max(2, _cdiv(B_p8, batch_tile_target))
    else:
        n_bt = 1
    batch_tile = _round_up(_cdiv(B_p8, n_bt), 8)

    def _plan(bt):
        nb = _cdiv(B_p8, bt)
        return bt, nb, nb * bt

    bias_bytes = 8 * (hid_p + emb_p) * 4

    def _epilogue_bytes(bt):
        # f32 h + compute-dtype h copy + f32 pre-cast out tile
        return bt * hid_p * (4 + csz) + bt * emb_p * 4

    def _bytes_resident(bt):
        return (2 * bt * in_p * csz            # x tile (double-buffered)
                + 2 * in_p * hid_p * csz       # W1 resident (conservative x2)
                + 2 * hid_p * emb_p * csz      # W2 resident (conservative x2)
                + 2 * bt * emb_p * osz         # out tile (double-buffered)
                + _epilogue_bytes(bt) + bias_bytes)

    def _bytes_ktiled(bt, kt):
        return (2 * bt * kt * csz              # x K-slab
                + 2 * kt * hid_p * csz         # W1 K-slab
                + 2 * hid_p * emb_p * csz      # W2 resident
                + 2 * bt * emb_p * osz         # out tile
                + bt * hid_p * 4               # f32 accumulator scratch
                + _epilogue_bytes(bt) + bias_bytes)

    # ---- path selection -----------------------------------------------------
    bt_a = batch_tile
    while _bytes_resident(bt_a) > budget and bt_a > 64:
        bt_a = _round_up(bt_a // 2, 8)
    use_k_axis = force_k_split or (_bytes_resident(bt_a) > budget)

    if not use_k_axis:
        batch_tile, n_bt, B_p = _plan(bt_a)
        k_tile, n_k, in_pp = in_p, 1, in_p
        vmem_needed = _bytes_resident(batch_tile)
    else:
        # Even K split: last-slab padding is at most 127 columns.
        n_k = max(1, _cdiv(in_p, k_tile_target))
        k_tile = _round_up(_cdiv(in_p, n_k), 128)
        n_k = _cdiv(in_p, k_tile)
        in_pp = n_k * k_tile

        while _bytes_ktiled(batch_tile, k_tile) > budget and batch_tile > 8:
            batch_tile = _round_up(batch_tile // 2, 8)
        batch_tile, n_bt, B_p = _plan(batch_tile)
        vmem_needed = _bytes_ktiled(batch_tile, k_tile)
        # TODO(synk): if hidden/embed grow so large that resident W2 alone
        # blows the budget, also tile hidden/embed for the second matmul.
        assert vmem_needed <= budget, (
            f"needs {vmem_needed} B VMEM (> {budget}); add hidden/embed tiling")

    vmem_limit = int(min(max(vmem_needed * 1.5 + (8 << 20), 32 << 20),
                         cap * 0.9))
    vmem_limit = max(vmem_limit, vmem_needed)

    # ---- operand prep: cast/pad only when actually needed -------------------
    def _prep(a, rows, cols, dtype):
        if a.dtype != dtype:
            a = a.astype(dtype)
        pr, pc = rows - a.shape[0], cols - a.shape[1]
        if pr or pc:
            a = jnp.pad(a, ((0, pr), (0, pc)))     # zeros are exact no-ops
        return a

    x_p = _prep(x, B_p, in_pp, compute_dtype)
    w1_p = _prep(w1, in_pp, hid_p, compute_dtype)
    b1_p = _prep(b1, 1, hid_p, jnp.float32)
    w2_p = _prep(w2, hid_p, emb_p, compute_dtype)
    b2_p = _prep(b2, 1, emb_p, jnp.float32)

    # ---- grid / specs --------------------------------------------------------
    if not use_k_axis:
        grid = (n_bt,)
        in_specs = [
            pl.BlockSpec((batch_tile, in_pp), lambda i: (i, 0)),   # x
            pl.BlockSpec((in_pp, hid_p), lambda i: (0, 0)),        # W1 (resident)
            pl.BlockSpec((1, hid_p), lambda i: (0, 0)),            # b1
            pl.BlockSpec((hid_p, emb_p), lambda i: (0, 0)),        # W2 (resident)
            pl.BlockSpec((1, emb_p), lambda i: (0, 0)),            # b2
        ]
        out_specs = pl.BlockSpec((batch_tile, emb_p), lambda i: (i, 0))
        scratch_shapes = []
        kernel = _kernel_resident
        dim_sem = ("parallel",)
    else:
        grid = (n_bt, n_k)
        in_specs = [
            pl.BlockSpec((batch_tile, k_tile), lambda i, k: (i, k)),   # x
            pl.BlockSpec((k_tile, hid_p), lambda i, k: (k, 0)),        # W1 slab
            pl.BlockSpec((1, hid_p), lambda i, k: (0, 0)),             # b1
            pl.BlockSpec((hid_p, emb_p), lambda i, k: (0, 0)),         # W2
            pl.BlockSpec((1, emb_p), lambda i, k: (0, 0)),             # b2
        ]
        out_specs = pl.BlockSpec((batch_tile, emb_p), lambda i, k: (i, 0))
        scratch_shapes = [pltpu.VMEM((batch_tile, hid_p), jnp.float32)]
        kernel = _kernel_ktiled
        dim_sem = ("parallel", "arbitrary")

    flops = 2 * B_p * (in_pp * hid_p + hid_p * emb_p)
    w1_reads = n_bt if use_k_axis else 1          # W1 restreamed only when K-tiled
    bytes_accessed = (x_p.size * csz + w1_p.size * csz * w1_reads
                      + w2_p.size * csz + b1_p.size * 4 + b2_p.size * 4
                      + B_p * emb_p * osz)

    out_p = pl.pallas_call(
        kernel,
        out_shape=jax.ShapeDtypeStruct((B_p, emb_p), out_dtype),
        grid_spec=pltpu.PrefetchScalarGridSpec(
            num_scalar_prefetch=0,
            grid=grid,
            in_specs=in_specs,
            out_specs=out_specs,
            scratch_shapes=scratch_shapes),
        compiler_params=pltpu.CompilerParams(
            dimension_semantics=dim_sem,
            vmem_limit_bytes=vmem_limit),
        cost_estimate=pl.CostEstimate(
            flops=flops, transcendentals=0, bytes_accessed=bytes_accessed),
    )(x_p, w1_p, b1_p, w2_p, b2_p)

    if B_p != B or emb_p != embed:
        out_p = out_p[:B, :embed]
    return out_p


def reference_forward(x, w1, b1, w2, b2):
    h = jnp.maximum(x @ w1 + b1.reshape(1, -1), 0.0)
    return h @ w2 + b2.reshape(1, -1)


def _make_params(key, B, in_f, hidden, embed):
    kx, kw1, kb1, kw2, kb2 = jax.random.split(key, 5)
    x = jax.random.normal(kx, (B, in_f), dtype=jnp.float32)
    w1 = jax.random.normal(kw1, (in_f, hidden), dtype=jnp.float32) * 0.05
    b1 = jax.random.normal(kb1, (1, hidden), dtype=jnp.float32) * 0.01
    w2 = jax.random.normal(kw2, (hidden, embed), dtype=jnp.float32) * 0.05
    b2 = jax.random.normal(kb2, (1, embed), dtype=jnp.float32) * 0.01
    return x, w1, b1, w2, b2


if __name__ == "__main__":
    key = jax.random.PRNGKey(0)
    k1, k2, k3, k4 = jax.random.split(key, 4)

    # Case 1: aligned shapes, W1-resident path (no K axis), multiple batch
    # tiles -> exercises pipelining + megacore batch sharding, bf16 MXU feed.
    x, w1, b1, w2, b2 = _make_params(k1, 1024, 256, 256, 128)
    out = jax.block_until_ready(base_forward(x, w1, b1, w2, b2))
    ref = reference_forward(x, w1, b1, w2, b2)
    assert out.shape == ref.shape
    assert jnp.allclose(out, ref, atol=5e-2, rtol=5e-2), "case 1 mismatch"

    # Case 2: small, lane/sublane-unaligned shapes -> exercises zero padding.
    x, w1, b1, w2, b2 = _make_params(k2, 8, 32, 64, 16)
    out = jax.block_until_ready(base_forward(x, w1, b1, w2, b2))
    ref = reference_forward(x, w1, b1, w2, b2)
    assert out.shape == ref.shape
    assert jnp.allclose(out, ref, atol=2e-2, rtol=2e-2), "case 2 mismatch"

    # Case 3: forced K-tiled fallback path (grid = batch tiles x K slabs),
    # exercises the f32 accumulator + direct-store-at-k==0 + epilogue.
    x, w1, b1, w2, b2 = _make_params(k3, 512, 512, 256, 128)
    out = jax.block_until_ready(base_forward(x, w1, b1, w2, b2,
                                             force_k_split=True,
                                             k_tile_target=128))
    ref = reference_forward(x, w1, b1, w2, b2)
    assert out.shape == ref.shape
    assert jnp.allclose(out, ref, atol=5e-2, rtol=5e-2), "case 3 mismatch"

    # Case 4: f32 compute path (bit-accurate escape hatch), tight tolerance.
    x, w1, b1, w2, b2 = _make_params(k4, 64, 128, 128, 128)
    out = jax.block_until_ready(base_forward(x, w1, b1, w2, b2,
                                             compute_dtype=jnp.float32))
    ref = reference_forward(x, w1, b1, w2, b2)
    assert out.shape == ref.shape
    assert jnp.allclose(out, ref, atol=2e-4, rtol=2e-4), "case 4 mismatch"

    print("KERNEL_OK")
</pallas_src>

<mosaic_0001>
module attributes {stable_mosaic.version = 11 : i64} {
  func.func @_kernel_resident(%arg0: i32, %arg1: memref<256x256xbf16, #tpu.memory_space<vmem>>, %arg2: memref<256x256xbf16, #tpu.memory_space<vmem>>, %arg3: memref<1x256xf32, #tpu.memory_space<vmem>>, %arg4: memref<256x128xbf16, #tpu.memory_space<vmem>>, %arg5: memref<1x128xf32, #tpu.memory_space<vmem>>, %arg6: memref<256x128xf32, #tpu.memory_space<vmem>>) attributes {dimension_semantics = [#tpu.dimension_semantics<parallel>], iteration_bounds = array<i64: 4>, scalar_prefetch = 0 : i64, scratch_operands = 0 : i64, tpu.core_type = #tpu.core_type<tc>, window_params = [{transform_indices = @transform_0, window_bounds = array<i64: 256, 256>}, {pipeline_mode = #tpu.pipeline_mode<synchronous>, transform_indices = @transform_1, window_bounds = array<i64: 256, 256>}, {pipeline_mode = #tpu.pipeline_mode<synchronous>, transform_indices = @transform_2, window_bounds = array<i64: 1, 256>}, {pipeline_mode = #tpu.pipeline_mode<synchronous>, transform_indices = @transform_3, window_bounds = array<i64: 256, 128>}, {pipeline_mode = #tpu.pipeline_mode<synchronous>, transform_indices = @transform_4, window_bounds = array<i64: 1, 128>}, {transform_indices = @transform_5, window_bounds = array<i64: 256, 128>}]} {
    %c0 = arith.constant 0 : index
    %c0_0 = arith.constant 0 : index
    %0 = vector.load %arg1[%c0, %c0_0] : memref<256x256xbf16, #tpu.memory_space<vmem>>, vector<256x256xbf16>
    %c0_1 = arith.constant 0 : index
    %c0_2 = arith.constant 0 : index
    %1 = vector.load %arg2[%c0_1, %c0_2] : memref<256x256xbf16, #tpu.memory_space<vmem>>, vector<256x256xbf16>
    %cst = arith.constant dense<0.000000e+00> : vector<256x256xf32>
    %2 = tpu.matmul %0, %1, %cst {dimension_numbers = #tpu.dot_dimension_numbers<[1], [0], [0], [1], [0, 0, 1, 1], [], []>} : vector<256x256xbf16>, vector<256x256xbf16>, vector<256x256xf32> -> vector<256x256xf32>
    %c0_3 = arith.constant 0 : index
    %c0_4 = arith.constant 0 : index
    %3 = vector.load %arg3[%c0_3, %c0_4] : memref<1x256xf32, #tpu.memory_space<vmem>>, vector<1x256xf32>
    %4 = vector.broadcast %3 : vector<1x256xf32> to vector<256x256xf32>
    %5 = arith.addf %2, %4 : vector<256x256xf32>
    %cst_5 = arith.constant 0.000000e+00 : f32
    %6 = vector.broadcast %cst_5 : f32 to vector<256x256xf32>
    %7 = arith.maximumf %5, %6 : vector<256x256xf32>
    %8 = arith.truncf %7 : vector<256x256xf32> to vector<256x256xbf16>
    %c0_6 = arith.constant 0 : index
    %c0_7 = arith.constant 0 : index
    %9 = vector.load %arg4[%c0_6, %c0_7] : memref<256x128xbf16, #tpu.memory_space<vmem>>, vector<256x128xbf16>
    %cst_8 = arith.constant dense<0.000000e+00> : vector<256x128xf32>
    %10 = tpu.matmul %8, %9, %cst_8 {dimension_numbers = #tpu.dot_dimension_numbers<[1], [0], [0], [1], [0, 0, 1, 1], [], []>} : vector<256x256xbf16>, vector<256x128xbf16>, vector<256x128xf32> -> vector<256x128xf32>
    %c0_9 = arith.constant 0 : index
    %c0_10 = arith.constant 0 : index
    %11 = vector.load %arg5[%c0_9, %c0_10] : memref<1x128xf32, #tpu.memory_space<vmem>>, vector<1x128xf32>
    %12 = vector.broadcast %11 : vector<1x128xf32> to vector<256x128xf32>
    %13 = arith.addf %10, %12 : vector<256x128xf32>
    %c0_11 = arith.constant 0 : index
    %c0_12 = arith.constant 0 : index
    %14 = vector.load %arg6[%c0_11, %c0_12] : memref<256x128xf32, #tpu.memory_space<vmem>>, vector<256x128xf32>
    tpu.vector_store %arg6[%c0_11, %c0_12], %13 {strides = array<i32>} : memref<256x128xf32, #tpu.memory_space<vmem>>, vector<256x128xf32>,
    return
  }
  func.func @transform_0(%arg0: i32) -> (i32, i32) {
    %c0_i32 = arith.constant 0 : i32
    %c0_i32_0 = arith.constant 0 : i32
    return %arg0, %c0_i32 : i32, i32
  }
  func.func @transform_1(%arg0: i32) -> (i32, i32) {
    %c0_i32 = arith.constant 0 : i32
    %c0_i32_0 = arith.constant 0 : i32
    %c0_i32_1 = arith.constant 0 : i32
    return %c0_i32, %c0_i32_0 : i32, i32
  }
  func.func @transform_2(%arg0: i32) -> (i32, i32) {
    %c0_i32 = arith.constant 0 : i32
    %c0_i32_0 = arith.constant 0 : i32
    %c0_i32_1 = arith.constant 0 : i32
    return %c0_i32, %c0_i32_0 : i32, i32
  }
  func.func @transform_3(%arg0: i32) -> (i32, i32) {
    %c0_i32 = arith.constant 0 : i32
    %c0_i32_0 = arith.constant 0 : i32
    %c0_i32_1 = arith.constant 0 : i32
    return %c0_i32, %c0_i32_0 : i32, i32
  }
  func.func @transform_4(%arg0: i32) -> (i32, i32) {
    %c0_i32 = arith.constant 0 : i32
    %c0_i32_0 = arith.constant 0 : i32
    %c0_i32_1 = arith.constant 0 : i32
    return %c0_i32, %c0_i32_0 : i32, i32
  }
  func.func @transform_5(%arg0: i32) -> (i32, i32) {
    %c0_i32 = arith.constant 0 : i32
    %c0_i32_0 = arith.constant 0 : i32
    return %arg0, %c0_i32 : i32, i32
  }
}

</mosaic_0001>

<bundles_post_ra>
// kernel: tpu_custom_call.1
= control target key start
LH: loop header
LB: loop body
LE: loop exit
PB: predicated region body
PF: predicated region fallthrough
CT: control target
= control target key end

     0   :  { %10 = vsyncpa [#allocation3], 0  ;;  %s2405_s0 = inlined_call_operand.hbm [shape: bf16[1024,256], index: 0, kind: input, shape index: {}]   ;;  %s2406_s1 = inlined_call_operand.hbm [shape: bf16[256,256], index: 1, kind: input, shape index: {}]   ;;  %s2407_s2 = inlined_call_operand.vmem [shape: f32[1,256], index: 2, kind: input, shape index: {}]   ;;  %s2408_s3 = inlined_call_operand.hbm [shape: bf16[256,128], index: 3, kind: input, shape index: {}]   ;;  %s2409_s4 = inlined_call_operand.vmem [shape: f32[1,128], index: 4, kind: input, shape index: {}]   ;;  %s2410_s5 = inlined_call_operand.hbm [shape: f32[1024,128], index: 5, kind: output, shape index: {}]  }
   0x1   :  { %12 = vsyncpa [#allocation3 + $0x1], 0 }
   0x2   :  { %13 = vsyncpa [#allocation6], 0 }
   0x3   :  { %14 = vsyncpa [#allocation4], 0 }
   0x4   :  { %16 = vsyncpa [#allocation4 + $0x1], 0  ;;  %s1993_s18 = smov 0   ;;  %s1995_s19 = smov 0  }
   0x5   :  { %s1997_s20 = smov 0   ;;  %s1999_s21 = smov 0  }
   0x6 LB: > { %s2014_s22 = sadd.s32 4294967295, %s1951_s21   ;;  %s1395_s23 = sadd.s32 4294967294, %s1951_s21   ;;  %s1951_s21 = sphi %s1999_s21, %s2429_s21   ;;  %s1947_s20 = sphi %s1997_s20, %s2428_s20   ;;  %s1943_s19 = sphi %s1995_s19, %s2427_s19   ;;  %s1939_s18 = sphi %s1993_s18, %s2426_s18  }
   0x7   : > { %p42_p0 = scmp.ne.s32.totalorder %s1943_s19, %s1939_s18  ;;  %p2411_p1 = scmp.eq.s32.totalorder %s2014_s22, 0 }
   0x8   : > { %p156_p3 = scmp.eq.s32.totalorder %s1395_s23, 3  ;;  %p1396_p5 = scmp.ge.s32.totalorder %s1951_s21, 1 }
   0x9   : > { %p2023_p4 = por %p2411_p1, %p42_p0  ;;  %p163_p7 = scmp.lt.s32.totalorder %s1951_s21, 5 }
   0xa   : > { %p2028_p6 = por %p156_p3, %p42_p0  ;;  %s1953_s27 = smov [#allocation5]  }
   0xb   : > { %s2414_s24 = scalar_select %p2023_p4, 1, 0 }
   0xc   : > { %s2415_s25 = scalar_select %p2028_p6, 1, 0 }
   0xd   : > { %p2033_p8 = pnand %p1396_p5, %p163_p7  ;;  %s175_s28 = sshll.u32 %s1953_s27, 4  ;;  %s176_s28 = int_to_ptr.vmem [resolvable:$true] %s175_s28 }
   0xe   : > { %s1954_s30 = smov [#allocation7]   ;;  %s1795_s9 = scalar_lea.hbm %s2406_s1, 4096 }
   0xf   : > { %s2416_s26 = scalar_select %p2033_p8, 1, 0 }
  0x10   : > { %p1622_p9 = pneg %p2033_p8  ;;  %s191_s6 = sshll.u32 %s1954_s30, 4  ;;  %s2045_s6 = int_to_ptr.vmem [resolvable:$true] %s191_s6 }
  0x11   : > { %p1796_p11 = scmp.ne.s32.totalorder %s2406_s1, %s1795_s9  ;;  %p1802_p3 = scmp.lt.u32.totalorder %s1795_s9, %s2406_s1 }
  0x12   : > { %p2041_p10 = pnand %p1622_p9, %p2411_p1 }
  0x14   : > { %p1797_p12 = pneg %p2041_p10 }
  0x16   : > { %p1798_p13 = pnand %p1797_p12, %p1796_p11 }
  0x18   : > { %p1799_p0 = pneg %p1798_p13 }
  0x1a   : > { %p1804_p5 = pnand %p1802_p3, %p1799_p0 }
  0x1c   : > { %1807 = shalt.err (!%p1804_p5)
}
  0x1d   : > { %s1808_s14 = scalar_lea.vmem %s176_s28, 4096  ;;  %p1816_p2 = scmp.lt.s32.totalorder %s176_s28, %s176_s28 }
  0x1e   : > { %p1809_p7 = scmp.ne.s32.totalorder %s176_s28, %s1808_s14  ;;  %p1817_p6 = scmp.lt.s32.totalorder %s1808_s14, %s1808_s14 }
  0x20   : > { %p1811_p9 = pnand %p1809_p7, %p1797_p12  ;;  %p1818_p4 = por %p1817_p6, %p1816_p2 }
  0x22   : > { %p1812_p1 = pneg %p1811_p9 }
  0x24   : > { %p1819_p8 = pnand %p1818_p4, %p1812_p1 }
  0x26   : > { %1822 = shalt.err (!%p1819_p8)
}
  0x27   : > { %s1955_s15 = smov 128   ;;  %s1956_s16 = smov 8  }
  0x28   : > { %1625 = dma.hbm_to_vmem [thread:$0]  (!%p2041_p10), %s2406_s1, 4096, %s176_s28, [#allocation6], %s1955_s15, %s1955_s15, %s1956_s16  }
  0x29   : > { %s1823_s7 = scalar_lea.hbm %s2408_s3, 2048 }
  0x2a   : > { %p1824_p1 = scmp.ne.s32.totalorder %s2408_s3, %s1823_s7  ;;  %p1830_p6 = scmp.lt.u32.totalorder %s1823_s7, %s2408_s3 }
  0x2c   : > { %p1826_p2 = pnand %p1824_p1, %p1797_p12 }
  0x2e   : > { %p1827_p4 = pneg %p1826_p2 }
  0x30   : > { %p1832_p8 = pnand %p1830_p6, %p1827_p4 }
  0x32   : > { %1835 = shalt.err (!%p1832_p8)
}
  0x33   : > { %s1836_s28 = scalar_lea.vmem %s2045_s6, 2048  ;;  %p1844_p3 = scmp.lt.s32.totalorder %s2045_s6, %s2045_s6 }
  0x34   : > { %p1837_p11 = scmp.ne.s32.totalorder %s2045_s6, %s1836_s28  ;;  %p1845_p5 = scmp.lt.s32.totalorder %s1836_s28, %s1836_s28 }
  0x36   : > { %p1839_p13 = pnand %p1837_p11, %p1797_p12  ;;  %p1846_p7 = por %p1845_p5, %p1844_p3 }
  0x38   : > { %p1840_p0 = pneg %p1839_p13 }
  0x3a   : > { %p1847_p9 = pnand %p1846_p7, %p1840_p0 }
  0x3c   : > { %1850 = shalt.err (!%p1847_p9)
}
  0x3d   : > { %s1957_s12 = smov 64   ;;  %s1958_s13 = smov 4  }
  0x3e   : > { %1628 = dma.hbm_to_vmem [thread:$0]  (!%p2041_p10), %s2408_s3, 2048, %s2045_s6, [#allocation6], %s1957_s12, %s1957_s12, %s1958_s13  }
  0x3f   : > { %s2098_s23 = sadd.s32 1, %s1951_s21   ;;  %s29_s30 = sadd.s32 1, %s1947_s20 }
  0x40   : > { %s26_s27 = ssub.s32 %s1951_s21, %s2098_s23  ;;  %p36_p1 = scmp.ne.s32.totalorder %s1947_s20, %s1943_s19 }
  0x41   : > { %p27_p12 = scmp.eq.s32.totalorder %s26_s27, 0  ;;  %p37_p2 = scmp.eq.s32.totalorder %s1951_s21, 0 }
  0x42   : > { %p2418_p6 = scmp.eq.s32.totalorder %s2014_s22, 3  ;;  %p1639_p11 = scmp.lt.s32.totalorder %s1951_s21, 4 }
  0x43   : > { %s2107_s7 = scalar_select %p27_p12, %s1947_s20, %s29_s30  }
  0x44   : > { %p38_p4 = por %p37_p2, %p36_p1  ;;  %p2111_p8 = por %p2418_p6, %p36_p1 }
  0x45   : > { %s208_s29 = sand.u32 1, %s1947_s20   ;;  %s1496_s6 = sshll.u32 %s1951_s21, 12 }
  0x46   : > { %s1400_s9 = sshll.u32 %s208_s29, 8  ;;  %s2121_s28 = scalar_lea.hbm %s2405_s0, %s1496_s6 }
  0x47   : > { %s212_s12 = scalar_lea.vmem [#allocation2], %s1400_s9  ;;  %p2125_p10 = pnand %p1639_p11, %p38_p4 }
  0x48   : > { %s220_s13 = sshll.u32 %s212_s12, 4  ;;  %s2129_s17 = scalar_lea.sflag [#allocation3], %s208_s29  ;;  %s2123_s13 = int_to_ptr.vmem [resolvable:$true] %s220_s13 }
  0x49   : > { %s1851_s27 = scalar_lea.hbm %s2121_s28, 4096  ;;  %p1853_p0 = pneg %p2125_p10 }
  0x4a   : > { %p1852_p13 = scmp.ne.s32.totalorder %s2121_s28, %s1851_s27  ;;  %s1856_s6 = scalar_lea.hbm %s2405_s0, 16384 }
  0x4b   : > { %p1857_p7 = scmp.lt.u32.totalorder %s2121_s28, %s2405_s0  ;;  %p1858_p9 = scmp.lt.u32.totalorder %s1856_s6, %s1851_s27 }
  0x4c   : > { %p1854_p3 = pnand %p1853_p0, %p1852_p13  ;;  %p1860_p1 = scmp.lt.u32.totalorder %s1851_s27, %s2121_s28 }
  0x4d   : > { %p1859_p12 = por %p1858_p9, %p1857_p7 }
  0x4e   : > { %p1855_p5 = pneg %p1854_p3 }
  0x4f   : > { %p1861_p2 = por %p1860_p1, %p1859_p12 }
  0x51   : > { %p1862_p4 = pnand %p1861_p2, %p1855_p5 }
  0x53   : > { %1865 = shalt.err (!%p1862_p4)
}
  0x54   : > { %s1866_s29 = scalar_lea.vmem %s2123_s13, 4096  ;;  %s1959_s12 = smov [#allocation2]  }
  0x55   : > { %p1867_p6 = scmp.ne.s32.totalorder %s2123_s13, %s1866_s29  ;;  %s1871_s30 = sshll.u32 %s1959_s12, 4  ;;  %s1872_s30 = int_to_ptr.vmem [resolvable:$false] %s1871_s30 }
  0x56   : > { %s1873_s9 = scalar_lea.vmem %s1872_s30, 8192  ;;  %p1874_p3 = scmp.lt.s32.totalorder %s2123_s13, %s1872_s30 }
  0x57   : > { %p1869_p11 = pnand %p1867_p6, %p1853_p0  ;;  %p1875_p7 = scmp.lt.s32.totalorder %s1873_s9, %s1866_s29 }
  0x59   : > { %p1870_p13 = pneg %p1869_p11  ;;  %p1876_p9 = por %p1875_p7, %p1874_p3 }
  0x5b   : > { %p1877_p12 = pnand %p1876_p9, %p1870_p13 }
  0x5d   : > { %1880 = shalt.err (!%p1877_p12)
}
  0x5e   : > { %1632 = dma.hbm_to_vmem [thread:$0]  (!%p2125_p10), %s2121_s28, 4096, %s2123_s13, %s2129_s17, %s1955_s15, %s1955_s15, %s1956_s16  }
  0x5f   : > { %p2421_p0 = scmp.ne.s32.totalorder %s2416_s26, 0 }
  0x60   : > { %s2163_s27 = sand.u32 (!%p2421_p0), 1, %s1943_s19   ;;  %p2422_p5 = scmp.ne.s32.totalorder (!%p2421_p0), %s2414_s24, 0 }
  0x61   : > { %232 = sbr.rel (%p2421_p0) target bundleno = 749 (0x2ed), region = 40  ;;  %s1405_s6 = sshll.u32 (!%p2421_p0), %s2163_s27, 8 }
  0x62   : > { %s235_s10 = scalar_lea.sflag (!%p2421_p0), [#allocation3], %s2163_s27  ;;  %s2169_s14 = scalar_lea.vmem (!%p2421_p0), [#allocation2], %s1405_s6 }
  0x68   : > { %1926 = dma.done.wait (%p2422_p5), %s235_s10, 4096  }
  0x69   : > { %1928 = vsyncadd (%p2422_p5), %s235_s10, 4294963200  ;;  %p2423_p10 = scmp.eq.s32.totalorder %s2014_s22, 0 }
  0x6b   : > { %1930 = dma.done.wait (%p2423_p10), [#allocation6], 6144   ;;  %p2424_p1 = pmov %p2423_p10 }
  0x6c   : > { %v1683_v0 = vld [vmem:[#allocation5 + $0x4] ss:$8 sps:$4 sm:$0xff]   ;;  %v1685_v1 = vld [vmem:[#allocation5] ss:$8 sps:$4 sm:$0xff]   ;;  %v1686_v2 = vld [vmem:[#allocation5 + $0x14] ss:$8 sps:$4 sm:$0xff]  }
  0x6d   : > { %1932 = vsyncadd (%p2424_p1), [#allocation6], 4294961152  ;;  %672 = vmatprep.subr.bf16.mxu0 %v1683_v0  ;;  %v1688_v3 = vld [vmem:[#allocation5 + $0x10] ss:$8 sps:$4 sm:$0xff]   ;;  %v1689_v4 = vld [vmem:[#allocation5 + $0x24] ss:$8 sps:$4 sm:$0xff]  }
  0x6e   : > { %673 = vmatpush1.bf16.msra.mxu0 %v1685_v1  ;;  %v1691_v5 = vld [vmem:[#allocation5 + $0x20] ss:$8 sps:$4 sm:$0xff]   ;;  %v1692_v6 = vld [vmem:[#allocation5 + $0x34] ss:$8 sps:$4 sm:$0xff]   ;;  %v1694_v7 = vld [vmem:[#allocation5 + $0x30] ss:$8 sps:$4 sm:$0xff]  }
  0x6f   : > { %674 = vmatprep.subr.bf16.mxu0 %v1686_v2  ;;  %v1695_v8 = vld [vmem:[#allocation5 + $0x44] ss:$8 sps:$4 sm:$0xff]   ;;  %v1697_v9 = vld [vmem:[#allocation5 + $0x40] ss:$8 sps:$4 sm:$0xff]   ;;  %v1698_v10 = vld [vmem:[#allocation5 + $0x54] ss:$8 sps:$4 sm:$0xff]  }
  0x70   : > { %v1700_v11 = vld [vmem:[#allocation5 + $0x50] ss:$8 sps:$4 sm:$0xff]   ;;  %v1701_v12 = vld [vmem:[#allocation5 + $0x64] ss:$8 sps:$4 sm:$0xff]   ;;  %v1703_v14 = vld [vmem:[#allocation5 + $0x60] ss:$8 sps:$4 sm:$0xff]  }
  0x71   : > { %v1733_v13 = vld [vmem:[%s2169_s14 + $0x4] ss:$8 sps:$4 sm:$0xff]   ;;  %v1704_v15 = vld [vmem:[#allocation5 + $0x74] ss:$8 sps:$4 sm:$0xff]   ;;  %v1706_v16 = vld [vmem:[#allocation5 + $0x70] ss:$8 sps:$4 sm:$0xff]  }
  0x72   : > { %675 = vmatpush1.bf16.msra.mxu0 %v1688_v3  ;;  %704 = vmatprep.mubr.bf16.mxu0 %v1733_v13  ;;  %v1707_v17 = vld [vmem:[#allocation5 + $0x84] ss:$8 sps:$4 sm:$0xff]   ;;  %v1709_v18 = vld [vmem:[#allocation5 + $0x80] ss:$8 sps:$4 sm:$0xff]   ;;  %v1710_v19 = vld [vmem:[#allocation5 + $0x94] ss:$8 sps:$4 sm:$0xff]  }
  0x73   : > { %676 = vmatprep.subr.bf16.mxu0 %v1689_v4  ;;  %v1712_v20 = vld [vmem:[#allocation5 + $0x90] ss:$8 sps:$4 sm:$0xff]   ;;  %v1713_v21 = vld [vmem:[#allocation5 + $0xa4] ss:$8 sps:$4 sm:$0xff]   ;;  %v1715_v22 = vld [vmem:[#allocation5 + $0xa0] ss:$8 sps:$4 sm:$0xff]  }
  0x74   : > { %v1716_v23 = vld [vmem:[#allocation5 + $0xb4] ss:$8 sps:$4 sm:$0xff]   ;;  %v1718_v24 = vld [vmem:[#allocation5 + $0xb0] ss:$8 sps:$4 sm:$0xff]   ;;  %v1719_v25 = vld [vmem:[#allocation5 + $0xc4] ss:$8 sps:$4 sm:$0xff]  }
  0x75   : > { %v1721_v26 = vld [vmem:[#allocation5 + $0xc0] ss:$8 sps:$4 sm:$0xff]   ;;  %v1722_v27 = vld [vmem:[#allocation5 + $0xd4] ss:$8 sps:$4 sm:$0xff]   ;;  %v1724_v28 = vld [vmem:[#allocation5 + $0xd0] ss:$8 sps:$4 sm:$0xff]  }
  0x76   : > { %677 = vmatpush1.bf16.msra.mxu0 %v1691_v5  ;;  %v1725_v29 = vld [vmem:[#allocation5 + $0xe4] ss:$8 sps:$4 sm:$0xff]   ;;  %v1727_v30 = vld [vmem:[#allocation5 + $0xe0] ss:$8 sps:$4 sm:$0xff]   ;;  %v1728_v31 = vld [vmem:[#allocation5 + $0xf4] ss:$8 sps:$4 sm:$0xff]  }
  0x77   : > { %678 = vmatprep.subr.bf16.mxu0 %v1692_v6  ;;  %v1779_v32 = vld [vmem:[#allocation7 + $0x40] sm:$0xff]   ;;  %v1781_v34 = vld [vmem:[#allocation7 + $0x48] sm:$0xff]   ;;  %v1730_v35 = vld [vmem:[#allocation5 + $0xf0] ss:$8 sps:$4 sm:$0xff]   ;;  %s2290_s28 = scalar_lea.vmem [#allocation8], %s1405_s6  ;;  %s1497_s13 = sshll.u32 %s2014_s22, 12 }
  0x78   : > { %v1780_v33 = vld [vmem:[#allocation7] sm:$0xff]   ;;  %1498 = vmatprep.subr.bf16.mxu1 %v1779_v32  ;;  %v1782_v36 = vld [vmem:[#allocation7 + $0x8] sm:$0xff]   ;;  %v1783_v38 = vld [vmem:[#allocation7 + $0x50] sm:$0xff]   ;;  %s1303_s17 = sshll.u32 %s2290_s28, 4  ;;  %s2357_s12 = scalar_lea.hbm %s2410_s5, %s1497_s13  ;;  %s2359_s17 = int_to_ptr.vmem [resolvable:$true] %s1303_s17 }
  0x79   : > { %1499 = vmatpush3.bf16.msra.mxu1 %v1780_v33  ;;  %v1731_v37 = vld [vmem:[%s2169_s14] ss:$8 sps:$4 sm:$0xff]   ;;  %v1734_v39 = vld [vmem:[%s2169_s14 + $0x14] ss:$8 sps:$4 sm:$0xff]   ;;  %v1736_v43 = vld [vmem:[%s2169_s14 + $0x10] ss:$8 sps:$4 sm:$0xff]  }
  0x7a   : > { %679 = vmatpush1.bf16.msra.mxu0 %v1694_v7  ;;  %1500 = vmatprep.subr.bf16.mxu1 %v1781_v34  ;;  %v1784_v40 = vld [vmem:[#allocation7 + $0x10] sm:$0xff]   ;;  %v1785_v41 = vld [vmem:[#allocation7 + $0x58] sm:$0xff]   ;;  %v1787_v44 = vld [vmem:[#allocation7 + $0x60] sm:$0xff]   ;;  %s1290_s22 = scalar_lea.sflag [#allocation4], %s2163_s27  ;;  %s1881_s30 = scalar_lea.vmem %s2359_s17, 4096 }
  0x7b   : > { %680 = vmatprep.subr.bf16.mxu0 %v1695_v8  ;;  %v1786_v42 = vld [vmem:[#allocation7 + $0x18] sm:$0xff]   ;;  %v1737_v45 = vld [vmem:[%s2169_s14 + $0x24] ss:$8 sps:$4 sm:$0xff]   ;;  %v1739_v48 = vld [vmem:[%s2169_s14 + $0x20] ss:$8 sps:$4 sm:$0xff]   ;;  %p1882_p2 = scmp.ne.s32.totalorder %s2359_s17, %s1881_s30  ;;  %s1960_s9 = smov [#allocation8]  }
  0x7c   : > { %v1788_v46 = vld [vmem:[#allocation7 + $0x20] sm:$0xff]   ;;  %v1789_v47 = vld [vmem:[#allocation7 + $0x68] sm:$0xff]   ;;  %v1740_v49 = vld [vmem:[%s2169_s14 + $0x34] ss:$8 sps:$4 sm:$0xff]   ;;  %s1885_s6 = sshll.u32 %s1960_s9, 4  ;;  %s1886_s6 = int_to_ptr.vmem [resolvable:$false] %s1885_s6 }
  0x7d   : > { %1501 = vmatpush3.bf16.msra.mxu1 %v1782_v36  ;;  %v1742_v50 = vld [vmem:[%s2169_s14 + $0x30] ss:$8 sps:$4 sm:$0xff]   ;;  %v1743_v51 = vld [vmem:[%s2169_s14 + $0x44] ss:$8 sps:$4 sm:$0xff]   ;;  %v1745_v52 = vld [vmem:[%s2169_s14 + $0x40] ss:$8 sps:$4 sm:$0xff]   ;;  %p1883_p4 = pnand %p1882_p2, %p2111_p8  ;;  %p1888_p11 = scmp.lt.s32.totalorder %s2359_s17, %s1886_s6 }
  0x7e   : > { %681 = vmatpush1.bf16.msra.mxu0 %v1697_v9  ;;  %1502 = vmatprep.subr.bf16.mxu1 %v1783_v38  ;;  %v1746_v53 = vld [vmem:[%s2169_s14 + $0x54] ss:$8 sps:$4 sm:$0xff]   ;;  %v1748_v54 = vld [vmem:[%s2169_s14 + $0x50] ss:$8 sps:$4 sm:$0xff]   ;;  %v1749_v55 = vld [vmem:[%s2169_s14 + $0x64] ss:$8 sps:$4 sm:$0xff]  }
  0x7f   : > { %682 = vmatprep.subr.bf16.mxu0 %v1698_v10  ;;  %v1751_v56 = vld [vmem:[%s2169_s14 + $0x60] ss:$8 sps:$4 sm:$0xff]   ;;  %v1752_v57 = vld [vmem:[%s2169_s14 + $0x74] ss:$8 sps:$4 sm:$0xff]   ;;  %v1754_v58 = vld [vmem:[%s2169_s14 + $0x70] ss:$8 sps:$4 sm:$0xff]   ;;  %p1884_p6 = pneg %p1883_p4 }
  0x80   : > { %v1755_v59 = vld [vmem:[%s2169_s14 + $0x84] ss:$8 sps:$4 sm:$0xff]   ;;  %v1757_v60 = vld [vmem:[%s2169_s14 + $0x80] ss:$8 sps:$4 sm:$0xff]   ;;  %v1758_v61 = vld [vmem:[%s2169_s14 + $0x94] ss:$8 sps:$4 sm:$0xff]  }
  0x81   : > { %1503 = vmatpush3.bf16.msra.mxu1 %v1784_v40  ;;  %v1760_v62 = vld [vmem:[%s2169_s14 + $0x90] ss:$8 sps:$4 sm:$0xff]   ;;  %v1761_v63 = vld [vmem:[%s2169_s14 + $0xa4] ss:$8 sps:$4 sm:$0xff]   ;;  %v1763_v0 = vld [vmem:[%s2169_s14 + $0xa0] ss:$8 sps:$4 sm:$0xff]  }
  0x82   : > { %683 = vmatpush1.bf16.msra.mxu0 %v1700_v11  ;;  %1504 = vmatprep.subr.bf16.mxu1 %v1785_v41  ;;  %v1764_v1 = vld [vmem:[%s2169_s14 + $0xb4] ss:$8 sps:$4 sm:$0xff]   ;;  %v1790_v2 = vld [vmem:[#allocation7 + $0x28] sm:$0xff]   ;;  %v1766_v3 = vld [vmem:[%s2169_s14 + $0xb0] ss:$8 sps:$4 sm:$0xff]   ;;  %s1887_s10 = scalar_lea.vmem %s1886_s6, 8192 }
  0x83   : > { %684 = vmatprep.subr.bf16.mxu0 %v1701_v12  ;;  %v1791_v4 = vld [vmem:[#allocation7 + $0x70] sm:$0xff]   ;;  %v1767_v5 = vld [vmem:[%s2169_s14 + $0xc4] ss:$8 sps:$4 sm:$0xff]   ;;  %v1793_v7 = vld [vmem:[#allocation7 + $0x78] sm:$0xff]   ;;  %p1889_p13 = scmp.lt.s32.totalorder %s1887_s10, %s1881_s30 }
  0x84   : > { %v1792_v6 = vld [vmem:[#allocation7 + $0x30] sm:$0xff]   ;;  %v1794_v8 = vld [vmem:[#allocation7 + $0x38] sm:$0xff]   ;;  %v1769_v9 = vld [vmem:[%s2169_s14 + $0xc0] ss:$8 sps:$4 sm:$0xff]  }
  0x85   : > { %1505 = vmatpush3.bf16.msra.mxu1 %v1786_v42  ;;  %v1770_v10 = vld [vmem:[%s2169_s14 + $0xd4] ss:$8 sps:$4 sm:$0xff]   ;;  %v1772_v11 = vld [vmem:[%s2169_s14 + $0xd0] ss:$8 sps:$4 sm:$0xff]   ;;  %v1773_v12 = vld [vmem:[%s2169_s14 + $0xe4] ss:$8 sps:$4 sm:$0xff]   ;;  %p1890_p3 = por %p1889_p13, %p1888_p11 }
  0x86   : > { %685 = vmatpush1.bf16.msra.mxu0 %v1703_v14  ;;  %1506 = vmatprep.subr.bf16.mxu1 %v1787_v44  ;;  %v1775_v13 = vld [vmem:[%s2169_s14 + $0xe0] ss:$8 sps:$4 sm:$0xff]   ;;  %v1776_v14 = vld [vmem:[%s2169_s14 + $0xf4] ss:$8 sps:$4 sm:$0xff]  }
  0x87   : > { %686 = vmatprep.subr.bf16.mxu0 %v1704_v15  ;;  %v1778_v15 = vld [vmem:[%s2169_s14 + $0xf0] ss:$8 sps:$4 sm:$0xff]   ;;  %p1891_p7 = pnand %p1890_p3, %p1884_p6 }
  0x89   : > { %1507 = vmatpush3.bf16.msra.mxu1 %v1788_v46 }
  0x8a   : > { %687 = vmatpush1.bf16.msra.mxu0 %v1706_v16  ;;  %1508 = vmatprep.subr.bf16.mxu1 %v1789_v47  ;;  %v342_v16 = vlaneseq }
  0x8b   : > { %688 = vmatprep.subr.bf16.mxu0 %v1707_v17 }
  0x8c   : > { %v343_v17 = vshrl.u32 %v342_v16, 7 }
  0x8d   : > { %1509 = vmatpush3.bf16.msra.mxu1 %v1790_v2 }
  0x8e   : > { %689 = vmatpush1.bf16.msra.mxu0 %v1709_v18  ;;  %1510 = vmatprep.subr.bf16.mxu1 %v1791_v4  ;;  %v344_v18 = vsub.s32 0, %v343_v17 }
  0x8f   : > { %690 = vmatprep.subr.bf16.mxu0 %v1710_v19  ;;  %v340_v19 = vld [vmem:[%s2407_s2] sm:$0x3] }
  0x91   : > { %1511 = vmatpush3.bf16.msra.mxu1 %v1792_v6 }
  0x92   : > { %691 = vmatpush1.bf16.msra.mxu0 %v1712_v20  ;;  %1512 = vmatprep.subr.bf16.mxu1 %v1793_v7  ;;  %v348_v20 = vsub.s32 1, %v343_v17 }
  0x93   : > { %692 = vmatprep.subr.bf16.mxu0 %v1713_v21  ;;  %v2214_v21 = vrot.slane %v340_v19, %v344_v18 }
  0x95   : > { %1513 = vmatpush3.bf16.msra.mxu1 %v1794_v8 }
  0x96   : > { %693 = vmatpush1.bf16.msra.mxu0 %v1715_v22  ;;  %v2216_v22 = vrot.slane %v340_v19, %v348_v20 }
  0x97   : > { %694 = vmatprep.subr.bf16.mxu0 %v1716_v23 }
  0x9a   : > { %695 = vmatpush1.bf16.msra.mxu0 %v1718_v24 }
  0x9b   : > { %696 = vmatprep.subr.bf16.mxu0 %v1719_v25 }
  0x9e   : > { %697 = vmatpush1.bf16.msra.mxu0 %v1721_v26 }
  0x9f   : > { %698 = vmatprep.subr.bf16.mxu0 %v1722_v27 }
  0xa2   : > { %699 = vmatpush1.bf16.msra.mxu0 %v1724_v28 }
  0xa3   : > { %700 = vmatprep.subr.bf16.mxu0 %v1725_v29 }
  0xa6   : > { %701 = vmatpush1.bf16.msra.mxu0 %v1727_v30 }
  0xa7   : > { %702 = vmatprep.subr.bf16.mxu0 %v1728_v31 }
  0xaa   : > { %703 = vmatpush1.bf16.msra.mxu0 %v1730_v35 }
  0xad   : > { %705 = vmatmul.mubr.bf16.vlgmr.msra.gmra.mrb[0].mxu0 %v1731_v37 }
  0xae   : > { %714 = vmatprep.mubr.bf16.mxu0 %v1734_v39 }
  0xb5   : > { %715 = vmatmul.mubr.bf16.gmra.mrb[4].mxu0 %v1736_v43 }
  0xb6   : > { %724 = vmatprep.mubr.bf16.mxu0 %v1737_v45 }
  0xbd   : > { %725 = vmatmul.mubr.bf16.gmra.mrb[8].mxu0 %v1739_v48 }
  0xbe   : > { %734 = vmatprep.mubr.bf16.mxu0 %v1740_v49 }
  0xc5   : > { %735 = vmatmul.mubr.bf16.gmra.mrb[12].mxu0 %v1742_v50 }
  0xc6   : > { %744 = vmatprep.mubr.bf16.mxu0 %v1743_v51 }
  0xcd   : > { %745 = vmatmul.mubr.bf16.gmra.mrb[16].mxu0 %v1745_v52 }
  0xce   : > { %754 = vmatprep.mubr.bf16.mxu0 %v1746_v53 }
  0xd5   : > { %755 = vmatmul.mubr.bf16.gmra.mrb[20].mxu0 %v1748_v54 }
  0xd6   : > { %764 = vmatprep.mubr.bf16.mxu0 %v1749_v55 }
  0xdd   : > { %765 = vmatmul.mubr.bf16.gmra.mrb[24].mxu0 %v1751_v56 }
  0xde   : > { %774 = vmatprep.mubr.bf16.mxu0 %v1752_v57 }
  0xe5   : > { %775 = vmatmul.mubr.bf16.gmra.mrb[28].mxu0 %v1754_v58 }
  0xe6   : > { %784 = vmatprep.mubr.bf16.mxu0 %v1755_v59 }
  0xed   : > { %785 = vmatmul.mubr.bf16.gmra.mrb[32].mxu0 %v1757_v60 }
  0xee   : > { %794 = vmatprep.mubr.bf16.mxu0 %v1758_v61 }
  0xf5   : > { %795 = vmatmul.mubr.bf16.gmra.mrb[36].mxu0 %v1760_v62 }
  0xf6   : > { %804 = vmatprep.mubr.bf16.mxu0 %v1761_v63 }
  0xfd   : > { %805 = vmatmul.mubr.bf16.gmra.mrb[40].mxu0 %v1763_v0 }
  0xfe   : > { %814 = vmatprep.mubr.bf16.mxu0 %v1764_v1 }
 0x105   : > { %815 = vmatmul.mubr.bf16.gmra.mrb[44].mxu0 %v1766_v3 }
 0x106   : > { %824 = vmatprep.mubr.bf16.mxu0 %v1767_v5 }
 0x10d   : > { %825 = vmatmul.mubr.bf16.gmra.mrb[48].mxu0 %v1769_v9 }
 0x10e   : > { %834 = vmatprep.mubr.bf16.mxu0 %v1770_v10 }
 0x115   : > { %835 = vmatmul.mubr.bf16.gmra.mrb[52].mxu0 %v1772_v11 }
 0x116   : > { %844 = vmatprep.mubr.bf16.mxu0 %v1773_v12 }
 0x11d   : > { %845 = vmatmul.mubr.bf16.gmra.mrb[56].mxu0 %v1775_v13 }
 0x11e   : > { %854 = vmatprep.mubr.bf16.mxu0 %v1776_v14 }
 0x125   : > { %855 = vmatmul.mubr.bf16.gmra.mrb[60].mxu0 %v1778_v15 }
 0x180   : > { %v706_v23 = vpop.f32.mrb[0].mxu0 }
 0x181   : > { %v707_v24 = vadd.f32 %v706_v23, %v2214_v21  ;;  %v708_v25 = vpop.f32.mrb[1].mxu0 }
 0x182   : > { %v709_v26 = vadd.f32 %v708_v25, %v2216_v22  ;;  %v710_v27 = vpop.f32.mrb[2].mxu0 }
 0x183   : > { %v711_v28 = vadd.f32 %v710_v27, %v2214_v21  ;;  %v712_v29 = vpop.f32.mrb[3].mxu0  ;;  %v865_v31 = vmax.f32 %v707_v24, 0.0 }
 0x184   : > { %v713_v30 = vadd.f32 %v712_v29, %v2216_v22  ;;  %v866_v33 = vmax.f32 %v709_v26, 0.0 }
 0x185   : > { %v867_v32 = vmax.f32 %v711_v28, 0.0 }
 0x186   : > { %v868_v34 = vmax.f32 %v713_v30, 0.0 }
 0x187   : > { %v929_v35 = vpack.c.bf16 %v867_v32, %v865_v31 }
 0x188   : > { %v716_v36 = vpop.f32.mrb[4].mxu0  ;;  %v930_v37 = vpack.c.bf16 %v868_v34, %v866_v33 }
 0x189   : > { %v717_v38 = vadd.f32 %v716_v36, %v2214_v21  ;;  %v718_v39 = vpop.f32.mrb[5].mxu0 }
 0x18a   : > { %v719_v40 = vadd.f32 %v718_v39, %v2216_v22  ;;  %v720_v41 = vpop.f32.mrb[6].mxu0  ;;  %1128 = vmatprep.mubr.bf16.mxu1 %v930_v37 }
 0x18b   : > { %v721_v42 = vadd.f32 %v720_v41, %v2214_v21  ;;  %v722_v43 = vpop.f32.mrb[7].mxu0  ;;  %1129 = vmatmul.mubr.bf16.vlgmr.msra.gmra.mrb[0].mxu1 %v929_v35  ;;  %v869_v45 = vmax.f32 %v717_v38, 0.0 }
 0x18c   : > { %v723_v44 = vadd.f32 %v722_v43, %v2216_v22  ;;  %v870_v47 = vmax.f32 %v719_v40, 0.0 }
 0x18d   : > { %v871_v46 = vmax.f32 %v721_v42, 0.0 }
 0x18e   : > { %v872_v48 = vmax.f32 %v723_v44, 0.0 }
 0x18f   : > { %v931_v49 = vpack.c.bf16 %v871_v46, %v869_v45 }
 0x190   : > { %v932_v50 = vpack.c.bf16 %v872_v48, %v870_v47  ;;  %v726_v51 = vpop.f32.mrb[8].mxu0 }
 0x191   : > { %v727_v52 = vadd.f32 %v726_v51, %v2214_v21  ;;  %v728_v53 = vpop.f32.mrb[9].mxu0 }
 0x192   : > { %v729_v54 = vadd.f32 %v728_v53, %v2216_v22  ;;  %v730_v55 = vpop.f32.mrb[10].mxu0  ;;  %1136 = vmatprep.mubr.bf16.mxu1 %v932_v50 }
 0x193   : > { %v731_v56 = vadd.f32 %v730_v55, %v2214_v21  ;;  %v732_v57 = vpop.f32.mrb[11].mxu0  ;;  %1137 = vmatmul.mubr.bf16.gmra.mrb[4].mxu1 %v931_v49  ;;  %v873_v59 = vmax.f32 %v727_v52, 0.0 }
 0x194   : > { %v733_v58 = vadd.f32 %v732_v57, %v2216_v22  ;;  %v874_v61 = vmax.f32 %v729_v54, 0.0 }
 0x195   : > { %v875_v60 = vmax.f32 %v731_v56, 0.0 }
 0x196   : > { %v876_v62 = vmax.f32 %v733_v58, 0.0 }
 0x197   : > { %v933_v63 = vpack.c.bf16 %v875_v60, %v873_v59 }
 0x198   : > { %v934_v0 = vpack.c.bf16 %v876_v62, %v874_v61  ;;  %v736_v1 = vpop.f32.mrb[12].mxu0 }
 0x199   : > { %v737_v2 = vadd.f32 %v736_v1, %v2214_v21  ;;  %v738_v3 = vpop.f32.mrb[13].mxu0 }
 0x19a   : > { %v739_v4 = vadd.f32 %v738_v3, %v2216_v22  ;;  %v740_v5 = vpop.f32.mrb[14].mxu0  ;;  %1144 = vmatprep.mubr.bf16.mxu1 %v934_v0 }
 0x19b   : > { %v741_v6 = vadd.f32 %v740_v5, %v2214_v21  ;;  %v742_v7 = vpop.f32.mrb[15].mxu0  ;;  %1145 = vmatmul.mubr.bf16.gmra.mrb[8].mxu1 %v933_v63  ;;  %v877_v9 = vmax.f32 %v737_v2, 0.0 }
 0x19c   : > { %v743_v8 = vadd.f32 %v742_v7, %v2216_v22  ;;  %v878_v11 = vmax.f32 %v739_v4, 0.0 }
 0x19d   : > { %v879_v10 = vmax.f32 %v741_v6, 0.0 }
 0x19e   : > { %v880_v12 = vmax.f32 %v743_v8, 0.0 }
 0x19f   : > { %v935_v13 = vpack.c.bf16 %v879_v10, %v877_v9 }
 0x1a0   : > { %v936_v14 = vpack.c.bf16 %v880_v12, %v878_v11  ;;  %v746_v15 = vpop.f32.mrb[16].mxu0 }
 0x1a1   : > { %v747_v16 = vadd.f32 %v746_v15, %v2214_v21  ;;  %v748_v17 = vpop.f32.mrb[17].mxu0 }
 0x1a2   : > { %v749_v18 = vadd.f32 %v748_v17, %v2216_v22  ;;  %v750_v19 = vpop.f32.mrb[18].mxu0  ;;  %1152 = vmatprep.mubr.bf16.mxu1 %v936_v14 }
 0x1a3   : > { %v751_v20 = vadd.f32 %v750_v19, %v2214_v21  ;;  %v752_v23 = vpop.f32.mrb[19].mxu0  ;;  %1153 = vmatmul.mubr.bf16.gmra.mrb[12].mxu1 %v935_v13  ;;  %v881_v25 = vmax.f32 %v747_v16, 0.0 }
 0x1a4   : > { %v753_v24 = vadd.f32 %v752_v23, %v2216_v22  ;;  %v882_v27 = vmax.f32 %v749_v18, 0.0 }
 0x1a5   : > { %v883_v26 = vmax.f32 %v751_v20, 0.0 }
 0x1a6   : > { %v884_v28 = vmax.f32 %v753_v24, 0.0 }
 0x1a7   : > { %v937_v29 = vpack.c.bf16 %v883_v26, %v881_v25 }
 0x1a8   : > { %v938_v30 = vpack.c.bf16 %v884_v28, %v882_v27  ;;  %v756_v31 = vpop.f32.mrb[20].mxu0 }
 0x1a9   : > { %v757_v32 = vadd.f32 %v756_v31, %v2214_v21  ;;  %v758_v33 = vpop.f32.mrb[21].mxu0 }
 0x1aa   : > { %v759_v34 = vadd.f32 %v758_v33, %v2216_v22  ;;  %v760_v35 = vpop.f32.mrb[22].mxu0  ;;  %1160 = vmatprep.mubr.bf16.mxu1 %v938_v30 }
 0x1ab   : > { %v761_v36 = vadd.f32 %v760_v35, %v2214_v21  ;;  %v762_v37 = vpop.f32.mrb[23].mxu0  ;;  %1161 = vmatmul.mubr.bf16.gmra.mrb[16].mxu1 %v937_v29  ;;  %v885_v39 = vmax.f32 %v757_v32, 0.0 }
 0x1ac   : > { %v763_v38 = vadd.f32 %v762_v37, %v2216_v22  ;;  %v886_v41 = vmax.f32 %v759_v34, 0.0 }
 0x1ad   : > { %v887_v40 = vmax.f32 %v761_v36, 0.0 }
 0x1ae   : > { %v888_v42 = vmax.f32 %v763_v38, 0.0 }
 0x1af   : > { %v939_v43 = vpack.c.bf16 %v887_v40, %v885_v39 }
 0x1b0   : > { %v940_v44 = vpack.c.bf16 %v888_v42, %v886_v41  ;;  %v766_v45 = vpop.f32.mrb[24].mxu0 }
 0x1b1   : > { %v767_v46 = vadd.f32 %v766_v45, %v2214_v21  ;;  %v768_v47 = vpop.f32.mrb[25].mxu0 }
 0x1b2   : > { %v769_v48 = vadd.f32 %v768_v47, %v2216_v22  ;;  %v770_v49 = vpop.f32.mrb[26].mxu0  ;;  %1168 = vmatprep.mubr.bf16.mxu1 %v940_v44 }
 0x1b3   : > { %v771_v50 = vadd.f32 %v770_v49, %v2214_v21  ;;  %v772_v51 = vpop.f32.mrb[27].mxu0  ;;  %1169 = vmatmul.mubr.bf16.gmra.mrb[20].mxu1 %v939_v43  ;;  %v889_v53 = vmax.f32 %v767_v46, 0.0 }
 0x1b4   : > { %v773_v52 = vadd.f32 %v772_v51, %v2216_v22  ;;  %v890_v55 = vmax.f32 %v769_v48, 0.0 }
 0x1b5   : > { %v891_v54 = vmax.f32 %v771_v50, 0.0 }
 0x1b6   : > { %v892_v56 = vmax.f32 %v773_v52, 0.0 }
 0x1b7   : > { %v941_v57 = vpack.c.bf16 %v891_v54, %v889_v53 }
 0x1b8   : > { %v942_v58 = vpack.c.bf16 %v892_v56, %v890_v55  ;;  %v776_v59 = vpop.f32.mrb[28].mxu0 }
 0x1b9   : > { %v777_v60 = vadd.f32 %v776_v59, %v2214_v21  ;;  %v778_v61 = vpop.f32.mrb[29].mxu0 }
 0x1ba   : > { %v779_v62 = vadd.f32 %v778_v61, %v2216_v22  ;;  %v780_v63 = vpop.f32.mrb[30].mxu0  ;;  %1176 = vmatprep.mubr.bf16.mxu1 %v942_v58 }
 0x1bb   : > { %v781_v0 = vadd.f32 %v780_v63, %v2214_v21  ;;  %v782_v1 = vpop.f32.mrb[31].mxu0  ;;  %1177 = vmatmul.mubr.bf16.gmra.mrb[24].mxu1 %v941_v57  ;;  %v893_v3 = vmax.f32 %v777_v60, 0.0 }
 0x1bc   : > { %v783_v2 = vadd.f32 %v782_v1, %v2216_v22  ;;  %v894_v5 = vmax.f32 %v779_v62, 0.0 }
 0x1bd   : > { %v895_v4 = vmax.f32 %v781_v0, 0.0 }
 0x1be   : > { %v896_v6 = vmax.f32 %v783_v2, 0.0 }
 0x1bf   : > { %v943_v7 = vpack.c.bf16 %v895_v4, %v893_v3 }
 0x1c0   : > { %v944_v8 = vpack.c.bf16 %v896_v6, %v894_v5  ;;  %v786_v9 = vpop.f32.mrb[32].mxu0 }
 0x1c1   : > { %v787_v10 = vadd.f32 %v786_v9, %v2214_v21  ;;  %v788_v11 = vpop.f32.mrb[33].mxu0 }
 0x1c2   : > { %v789_v12 = vadd.f32 %v788_v11, %v2216_v22  ;;  %v790_v13 = vpop.f32.mrb[34].mxu0  ;;  %1184 = vmatprep.mubr.bf16.mxu1 %v944_v8 }
 0x1c3   : > { %v791_v14 = vadd.f32 %v790_v13, %v2214_v21  ;;  %v792_v15 = vpop.f32.mrb[35].mxu0  ;;  %1185 = vmatmul.mubr.bf16.gmra.mrb[28].mxu1 %v943_v7  ;;  %v897_v17 = vmax.f32 %v787_v10, 0.0 }
 0x1c4   : > { %v793_v16 = vadd.f32 %v792_v15, %v2216_v22  ;;  %v898_v19 = vmax.f32 %v789_v12, 0.0 }
 0x1c5   : > { %v899_v18 = vmax.f32 %v791_v14, 0.0 }
 0x1c6   : > { %v900_v20 = vmax.f32 %v793_v16, 0.0 }
 0x1c7   : > { %v945_v23 = vpack.c.bf16 %v899_v18, %v897_v17 }
 0x1c8   : > { %v946_v24 = vpack.c.bf16 %v900_v20, %v898_v19  ;;  %v796_v25 = vpop.f32.mrb[36].mxu0 }
 0x1c9   : > { %v797_v26 = vadd.f32 %v796_v25, %v2214_v21  ;;  %v798_v27 = vpop.f32.mrb[37].mxu0 }
 0x1ca   : > { %v799_v28 = vadd.f32 %v798_v27, %v2216_v22  ;;  %v800_v29 = vpop.f32.mrb[38].mxu0  ;;  %1192 = vmatprep.mubr.bf16.mxu1 %v946_v24 }
 0x1cb   : > { %v801_v30 = vadd.f32 %v800_v29, %v2214_v21  ;;  %v802_v31 = vpop.f32.mrb[39].mxu0  ;;  %1193 = vmatmul.mubr.bf16.gmra.mrb[32].mxu1 %v945_v23  ;;  %v901_v33 = vmax.f32 %v797_v26, 0.0 }
 0x1cc   : > { %v803_v32 = vadd.f32 %v802_v31, %v2216_v22  ;;  %v902_v35 = vmax.f32 %v799_v28, 0.0 }
 0x1cd   : > { %v903_v34 = vmax.f32 %v801_v30, 0.0 }
 0x1ce   : > { %v904_v36 = vmax.f32 %v803_v32, 0.0 }
 0x1cf   : > { %v947_v37 = vpack.c.bf16 %v903_v34, %v901_v33 }
 0x1d0   : > { %v948_v38 = vpack.c.bf16 %v904_v36, %v902_v35  ;;  %v806_v39 = vpop.f32.mrb[40].mxu0 }
 0x1d1   : > { %v807_v40 = vadd.f32 %v806_v39, %v2214_v21  ;;  %v808_v41 = vpop.f32.mrb[41].mxu0 }
 0x1d2   : > { %v809_v42 = vadd.f32 %v808_v41, %v2216_v22  ;;  %v810_v43 = vpop.f32.mrb[42].mxu0  ;;  %1200 = vmatprep.mubr.bf16.mxu1 %v948_v38 }
 0x1d3   : > { %v811_v44 = vadd.f32 %v810_v43, %v2214_v21  ;;  %v812_v45 = vpop.f32.mrb[43].mxu0  ;;  %1201 = vmatmul.mubr.bf16.gmra.mrb[36].mxu1 %v947_v37  ;;  %v905_v47 = vmax.f32 %v807_v40, 0.0 }
 0x1d4   : > { %v813_v46 = vadd.f32 %v812_v45, %v2216_v22  ;;  %v906_v49 = vmax.f32 %v809_v42, 0.0 }
 0x1d5   : > { %v907_v48 = vmax.f32 %v811_v44, 0.0 }
 0x1d6   : > { %v908_v50 = vmax.f32 %v813_v46, 0.0 }
 0x1d7   : > { %v949_v51 = vpack.c.bf16 %v907_v48, %v905_v47 }
 0x1d8   : > { %v950_v52 = vpack.c.bf16 %v908_v50, %v906_v49  ;;  %v816_v53 = vpop.f32.mrb[44].mxu0 }
 0x1d9   : > { %v817_v54 = vadd.f32 %v816_v53, %v2214_v21  ;;  %v818_v55 = vpop.f32.mrb[45].mxu0 }
 0x1da   : > { %v819_v56 = vadd.f32 %v818_v55, %v2216_v22  ;;  %v820_v57 = vpop.f32.mrb[46].mxu0  ;;  %1208 = vmatprep.mubr.bf16.mxu1 %v950_v52 }
 0x1db   : > { %v821_v58 = vadd.f32 %v820_v57, %v2214_v21  ;;  %v822_v59 = vpop.f32.mrb[47].mxu0  ;;  %1209 = vmatmul.mubr.bf16.gmra.mrb[40].mxu1 %v949_v51  ;;  %v909_v61 = vmax.f32 %v817_v54, 0.0 }
 0x1dc   : > { %v823_v60 = vadd.f32 %v822_v59, %v2216_v22  ;;  %v910_v63 = vmax.f32 %v819_v56, 0.0 }
 0x1dd   : > { %v911_v62 = vmax.f32 %v821_v58, 0.0 }
 0x1de   : > { %v912_v0 = vmax.f32 %v823_v60, 0.0 }
 0x1df   : > { %v951_v1 = vpack.c.bf16 %v911_v62, %v909_v61  ;;  %v2285_v62 = vld [vmem:[%s2409_s4] ss:$0 sm:$0xff] }
 0x1e0   : > { %v952_v2 = vpack.c.bf16 %v912_v0, %v910_v63  ;;  %v826_v3 = vpop.f32.mrb[48].mxu0 }
 0x1e1   : > { %v827_v4 = vadd.f32 %v826_v3, %v2214_v21  ;;  %v828_v5 = vpop.f32.mrb[49].mxu0 }
 0x1e2   : > { %v829_v6 = vadd.f32 %v828_v5, %v2216_v22  ;;  %v830_v7 = vpop.f32.mrb[50].mxu0  ;;  %1216 = vmatprep.mubr.bf16.mxu1 %v952_v2 }
 0x1e3   : > { %v831_v8 = vadd.f32 %v830_v7, %v2214_v21  ;;  %v832_v9 = vpop.f32.mrb[51].mxu0  ;;  %1217 = vmatmul.mubr.bf16.gmra.mrb[44].mxu1 %v951_v1  ;;  %v913_v11 = vmax.f32 %v827_v4, 0.0 }
 0x1e4   : > { %v833_v10 = vadd.f32 %v832_v9, %v2216_v22  ;;  %v914_v13 = vmax.f32 %v829_v6, 0.0 }
 0x1e5   : > { %v915_v12 = vmax.f32 %v831_v8, 0.0 }
 0x1e6   : > { %v916_v14 = vmax.f32 %v833_v10, 0.0 }
 0x1e7   : > { %v953_v15 = vpack.c.bf16 %v915_v12, %v913_v11 }
 0x1e8   : > { %v954_v16 = vpack.c.bf16 %v916_v14, %v914_v13  ;;  %v836_v17 = vpop.f32.mrb[52].mxu0 }
 0x1e9   : > { %v837_v18 = vadd.f32 %v836_v17, %v2214_v21  ;;  %v838_v19 = vpop.f32.mrb[53].mxu0 }
 0x1ea   : > { %v839_v20 = vadd.f32 %v838_v19, %v2216_v22  ;;  %v840_v23 = vpop.f32.mrb[54].mxu0  ;;  %1224 = vmatprep.mubr.bf16.mxu1 %v954_v16 }
 0x1eb   : > { %v841_v24 = vadd.f32 %v840_v23, %v2214_v21  ;;  %v842_v25 = vpop.f32.mrb[55].mxu0  ;;  %1225 = vmatmul.mubr.bf16.gmra.mrb[48].mxu1 %v953_v15  ;;  %v917_v27 = vmax.f32 %v837_v18, 0.0 }
 0x1ec   : > { %v843_v26 = vadd.f32 %v842_v25, %v2216_v22  ;;  %v918_v29 = vmax.f32 %v839_v20, 0.0 }
 0x1ed   : > { %v919_v28 = vmax.f32 %v841_v24, 0.0 }
 0x1ee   : > { %v920_v30 = vmax.f32 %v843_v26, 0.0 }
 0x1ef   : > { %v955_v31 = vpack.c.bf16 %v919_v28, %v917_v27 }
 0x1f0   : > { %v956_v32 = vpack.c.bf16 %v920_v30, %v918_v29  ;;  %v846_v33 = vpop.f32.mrb[56].mxu0 }
 0x1f1   : > { %v847_v34 = vadd.f32 %v846_v33, %v2214_v21  ;;  %v848_v35 = vpop.f32.mrb[57].mxu0 }
 0x1f2   : > { %v849_v36 = vadd.f32 %v848_v35, %v2216_v22  ;;  %v850_v37 = vpop.f32.mrb[58].mxu0  ;;  %1232 = vmatprep.mubr.bf16.mxu1 %v956_v32 }
 0x1f3   : > { %v851_v38 = vadd.f32 %v850_v37, %v2214_v21  ;;  %v852_v39 = vpop.f32.mrb[59].mxu0  ;;  %1233 = vmatmul.mubr.bf16.gmra.mrb[52].mxu1 %v955_v31  ;;  %v921_v41 = vmax.f32 %v847_v34, 0.0 }
 0x1f4   : > { %v853_v40 = vadd.f32 %v852_v39, %v2216_v22  ;;  %v922_v43 = vmax.f32 %v849_v36, 0.0 }
 0x1f5   : > { %v923_v42 = vmax.f32 %v851_v38, 0.0 }
 0x1f6   : > { %v924_v44 = vmax.f32 %v853_v40, 0.0 }
 0x1f7   : > { %v957_v45 = vpack.c.bf16 %v923_v42, %v921_v41 }
 0x1f8   : > { %v958_v46 = vpack.c.bf16 %v924_v44, %v922_v43  ;;  %v856_v47 = vpop.f32.mrb[60].mxu0 }
 0x1f9   : > { %v857_v48 = vadd.f32 %v856_v47, %v2214_v21  ;;  %v858_v49 = vpop.f32.mrb[61].mxu0 }
 0x1fa   : > { %v859_v50 = vadd.f32 %v858_v49, %v2216_v22  ;;  %v860_v51 = vpop.f32.mrb[62].mxu0  ;;  %1240 = vmatprep.mubr.bf16.mxu1 %v958_v46 }
 0x1fb   : > { %v861_v52 = vadd.f32 %v860_v51, %v2214_v21  ;;  %v862_v53 = vpop.f32.mrb[63].mxu0  ;;  %1241 = vmatmul.mubr.bf16.gmra.mrb[56].mxu1 %v957_v45  ;;  %v925_v55 = vmax.f32 %v857_v48, 0.0 }
 0x1fc   : > { %v863_v54 = vadd.f32 %v862_v53, %v2216_v22  ;;  %v926_v57 = vmax.f32 %v859_v50, 0.0 }
 0x1fd   : > { %v927_v56 = vmax.f32 %v861_v52, 0.0 }
 0x1fe   : > { %v928_v58 = vmax.f32 %v863_v54, 0.0 }
 0x1ff   : > { %v959_v59 = vpack.c.bf16 %v927_v56, %v925_v55 }
 0x200   : > { %v960_v60 = vpack.c.bf16 %v928_v58, %v926_v57 }
 0x202   : > { %1248 = vmatprep.mubr.bf16.mxu1 %v960_v60 }
 0x203   : > { %1249 = vmatmul.mubr.bf16.gmra.mrb[60].mxu1 %v959_v59 }
 0x25e   : > { %v1514_v61 = vpop.f32.mrb[0].mxu1 }
 0x25f   : > { %v1515_v21 = vpop.f32.mrb[1].mxu1 }
 0x260   : > { %v1516_v63 = vadd.f32 %v1515_v21, %v1514_v61  ;;  %v1517_v0 = vpop.f32.mrb[2].mxu1 }
 0x261   : > { %v1518_v1 = vpop.f32.mrb[3].mxu1 }
 0x262   : > { %v1131_v22 = vadd.f32 %v1516_v63, %v2285_v62  ;;  %v1519_v2 = vadd.f32 %v1518_v1, %v1517_v0 }
 0x264   : > { %1257 = vst [vmem:[%s2290_s28] sm:$0xff] %v1131_v22  ;;  %v1134_v3 = vadd.f32 %v1519_v2, %v2285_v62 }
 0x266   : > { %1258 = vst [vmem:[%s2290_s28 + $0x8] sm:$0xff] %v1134_v3  ;;  %v1520_v4 = vpop.f32.mrb[4].mxu1 }
 0x267   : > { %v1521_v5 = vpop.f32.mrb[5].mxu1 }
 0x268   : > { %v1522_v6 = vadd.f32 %v1521_v5, %v1520_v4  ;;  %v1523_v7 = vpop.f32.mrb[6].mxu1 }
 0x269   : > { %v1524_v8 = vpop.f32.mrb[7].mxu1 }
 0x26a   : > { %v1139_v9 = vadd.f32 %v1522_v6, %v2285_v62  ;;  %v1525_v10 = vadd.f32 %v1524_v8, %v1523_v7 }
 0x26c   : > { %1259 = vst [vmem:[%s2290_s28 + $0x10] sm:$0xff] %v1139_v9  ;;  %v1142_v11 = vadd.f32 %v1525_v10, %v2285_v62 }
 0x26e   : > { %1260 = vst [vmem:[%s2290_s28 + $0x18] sm:$0xff] %v1142_v11  ;;  %v1526_v12 = vpop.f32.mrb[8].mxu1 }
 0x26f   : > { %v1527_v13 = vpop.f32.mrb[9].mxu1 }
 0x270   : > { %v1528_v14 = vadd.f32 %v1527_v13, %v1526_v12  ;;  %v1529_v15 = vpop.f32.mrb[10].mxu1 }
 0x271   : > { %v1530_v16 = vpop.f32.mrb[11].mxu1 }
 0x272   : > { %v1147_v17 = vadd.f32 %v1528_v14, %v2285_v62  ;;  %v1531_v18 = vadd.f32 %v1530_v16, %v1529_v15 }
 0x274   : > { %1261 = vst [vmem:[%s2290_s28 + $0x20] sm:$0xff] %v1147_v17  ;;  %v1150_v19 = vadd.f32 %v1531_v18, %v2285_v62 }
 0x276   : > { %1262 = vst [vmem:[%s2290_s28 + $0x28] sm:$0xff] %v1150_v19  ;;  %v1532_v20 = vpop.f32.mrb[12].mxu1 }
 0x277   : > { %v1533_v23 = vpop.f32.mrb[13].mxu1 }
 0x278   : > { %v1534_v24 = vadd.f32 %v1533_v23, %v1532_v20  ;;  %v1535_v25 = vpop.f32.mrb[14].mxu1 }
 0x279   : > { %v1536_v26 = vpop.f32.mrb[15].mxu1 }
 0x27a   : > { %v1155_v27 = vadd.f32 %v1534_v24, %v2285_v62  ;;  %v1537_v28 = vadd.f32 %v1536_v26, %v1535_v25 }
 0x27c   : > { %1263 = vst [vmem:[%s2290_s28 + $0x30] sm:$0xff] %v1155_v27  ;;  %v1158_v29 = vadd.f32 %v1537_v28, %v2285_v62 }
 0x27e   : > { %1264 = vst [vmem:[%s2290_s28 + $0x38] sm:$0xff] %v1158_v29  ;;  %v1538_v30 = vpop.f32.mrb[16].mxu1 }
 0x27f   : > { %v1539_v31 = vpop.f32.mrb[17].mxu1 }
 0x280   : > { %v1540_v32 = vadd.f32 %v1539_v31, %v1538_v30  ;;  %v1541_v33 = vpop.f32.mrb[18].mxu1 }
 0x281   : > { %v1542_v34 = vpop.f32.mrb[19].mxu1 }
 0x282   : > { %v1163_v35 = vadd.f32 %v1540_v32, %v2285_v62  ;;  %v1543_v36 = vadd.f32 %v1542_v34, %v1541_v33 }
 0x284   : > { %1265 = vst [vmem:[%s2290_s28 + $0x40] sm:$0xff] %v1163_v35  ;;  %v1166_v37 = vadd.f32 %v1543_v36, %v2285_v62 }
 0x286   : > { %1266 = vst [vmem:[%s2290_s28 + $0x48] sm:$0xff] %v1166_v37  ;;  %v1544_v38 = vpop.f32.mrb[20].mxu1 }
 0x287   : > { %v1545_v39 = vpop.f32.mrb[21].mxu1 }
 0x288   : > { %v1546_v40 = vadd.f32 %v1545_v39, %v1544_v38  ;;  %v1547_v41 = vpop.f32.mrb[22].mxu1 }
 0x289   : > { %v1548_v42 = vpop.f32.mrb[23].mxu1 }
 0x28a   : > { %v1171_v43 = vadd.f32 %v1546_v40, %v2285_v62  ;;  %v1549_v44 = vadd.f32 %v1548_v42, %v1547_v41 }
 0x28c   : > { %1267 = vst [vmem:[%s2290_s28 + $0x50] sm:$0xff] %v1171_v43  ;;  %v1174_v45 = vadd.f32 %v1549_v44, %v2285_v62 }
 0x28e   : > { %1268 = vst [vmem:[%s2290_s28 + $0x58] sm:$0xff] %v1174_v45  ;;  %v1550_v46 = vpop.f32.mrb[24].mxu1 }
 0x28f   : > { %v1551_v47 = vpop.f32.mrb[25].mxu1 }
 0x290   : > { %v1552_v48 = vadd.f32 %v1551_v47, %v1550_v46  ;;  %v1553_v49 = vpop.f32.mrb[26].mxu1 }
 0x291   : > { %v1554_v50 = vpop.f32.mrb[27].mxu1 }
 0x292   : > { %v1179_v51 = vadd.f32 %v1552_v48, %v2285_v62  ;;  %v1555_v52 = vadd.f32 %v1554_v50, %v1553_v49 }
 0x294   : > { %1269 = vst [vmem:[%s2290_s28 + $0x60] sm:$0xff] %v1179_v51  ;;  %v1182_v53 = vadd.f32 %v1555_v52, %v2285_v62 }
 0x296   : > { %1270 = vst [vmem:[%s2290_s28 + $0x68] sm:$0xff] %v1182_v53  ;;  %v1556_v54 = vpop.f32.mrb[28].mxu1 }
 0x297   : > { %v1557_v55 = vpop.f32.mrb[29].mxu1 }
 0x298   : > { %v1558_v56 = vadd.f32 %v1557_v55, %v1556_v54  ;;  %v1559_v57 = vpop.f32.mrb[30].mxu1 }
 0x299   : > { %v1560_v58 = vpop.f32.mrb[31].mxu1 }
 0x29a   : > { %v1187_v59 = vadd.f32 %v1558_v56, %v2285_v62  ;;  %v1561_v60 = vadd.f32 %v1560_v58, %v1559_v57 }
 0x29c   : > { %1271 = vst [vmem:[%s2290_s28 + $0x70] sm:$0xff] %v1187_v59  ;;  %v1190_v61 = vadd.f32 %v1561_v60, %v2285_v62 }
 0x29e   : > { %1272 = vst [vmem:[%s2290_s28 + $0x78] sm:$0xff] %v1190_v61  ;;  %v1562_v21 = vpop.f32.mrb[32].mxu1 }
 0x29f   : > { %v1563_v63 = vpop.f32.mrb[33].mxu1 }
 0x2a0   : > { %v1564_v0 = vadd.f32 %v1563_v63, %v1562_v21  ;;  %v1565_v1 = vpop.f32.mrb[34].mxu1 }
 0x2a1   : > { %v1566_v22 = vpop.f32.mrb[35].mxu1 }
 0x2a2   : > { %v1195_v2 = vadd.f32 %v1564_v0, %v2285_v62  ;;  %v1567_v3 = vadd.f32 %v1566_v22, %v1565_v1 }
 0x2a4   : > { %1273 = vst [vmem:[%s2290_s28 + $0x80] sm:$0xff] %v1195_v2  ;;  %v1198_v4 = vadd.f32 %v1567_v3, %v2285_v62 }
 0x2a6   : > { %1274 = vst [vmem:[%s2290_s28 + $0x88] sm:$0xff] %v1198_v4  ;;  %v1568_v5 = vpop.f32.mrb[36].mxu1 }
 0x2a7   : > { %v1569_v6 = vpop.f32.mrb[37].mxu1 }
 0x2a8   : > { %v1570_v7 = vadd.f32 %v1569_v6, %v1568_v5  ;;  %v1571_v8 = vpop.f32.mrb[38].mxu1 }
 0x2a9   : > { %v1572_v9 = vpop.f32.mrb[39].mxu1 }
 0x2aa   : > { %v1203_v10 = vadd.f32 %v1570_v7, %v2285_v62  ;;  %v1573_v11 = vadd.f32 %v1572_v9, %v1571_v8 }
 0x2ac   : > { %1275 = vst [vmem:[%s2290_s28 + $0x90] sm:$0xff] %v1203_v10  ;;  %v1206_v12 = vadd.f32 %v1573_v11, %v2285_v62 }
 0x2ae   : > { %1276 = vst [vmem:[%s2290_s28 + $0x98] sm:$0xff] %v1206_v12  ;;  %v1574_v13 = vpop.f32.mrb[40].mxu1 }
 0x2af   : > { %v1575_v14 = vpop.f32.mrb[41].mxu1 }
 0x2b0   : > { %v1576_v15 = vadd.f32 %v1575_v14, %v1574_v13  ;;  %v1577_v16 = vpop.f32.mrb[42].mxu1 }
 0x2b1   : > { %v1578_v17 = vpop.f32.mrb[43].mxu1 }
 0x2b2   : > { %v1211_v18 = vadd.f32 %v1576_v15, %v2285_v62  ;;  %v1579_v19 = vadd.f32 %v1578_v17, %v1577_v16 }
 0x2b4   : > { %1277 = vst [vmem:[%s2290_s28 + $0xa0] sm:$0xff] %v1211_v18  ;;  %v1214_v20 = vadd.f32 %v1579_v19, %v2285_v62 }
 0x2b6   : > { %1278 = vst [vmem:[%s2290_s28 + $0xa8] sm:$0xff] %v1214_v20  ;;  %v1580_v23 = vpop.f32.mrb[44].mxu1 }
 0x2b7   : > { %v1581_v24 = vpop.f32.mrb[45].mxu1 }
 0x2b8   : > { %v1582_v25 = vadd.f32 %v1581_v24, %v1580_v23  ;;  %v1583_v26 = vpop.f32.mrb[46].mxu1 }
 0x2b9   : > { %v1584_v27 = vpop.f32.mrb[47].mxu1 }
 0x2ba   : > { %v1219_v28 = vadd.f32 %v1582_v25, %v2285_v62  ;;  %v1585_v29 = vadd.f32 %v1584_v27, %v1583_v26 }
 0x2bc   : > { %1279 = vst [vmem:[%s2290_s28 + $0xb0] sm:$0xff] %v1219_v28  ;;  %v1222_v30 = vadd.f32 %v1585_v29, %v2285_v62 }
 0x2be   : > { %1280 = vst [vmem:[%s2290_s28 + $0xb8] sm:$0xff] %v1222_v30  ;;  %v1586_v31 = vpop.f32.mrb[48].mxu1 }
 0x2bf   : > { %v1587_v32 = vpop.f32.mrb[49].mxu1 }
 0x2c0   : > { %v1588_v33 = vadd.f32 %v1587_v32, %v1586_v31  ;;  %v1589_v34 = vpop.f32.mrb[50].mxu1 }
 0x2c1   : > { %v1590_v35 = vpop.f32.mrb[51].mxu1 }
 0x2c2   : > { %v1227_v36 = vadd.f32 %v1588_v33, %v2285_v62  ;;  %v1591_v37 = vadd.f32 %v1590_v35, %v1589_v34 }
 0x2c4   : > { %1281 = vst [vmem:[%s2290_s28 + $0xc0] sm:$0xff] %v1227_v36  ;;  %v1230_v38 = vadd.f32 %v1591_v37, %v2285_v62 }
 0x2c6   : > { %1282 = vst [vmem:[%s2290_s28 + $0xc8] sm:$0xff] %v1230_v38  ;;  %v1592_v39 = vpop.f32.mrb[52].mxu1 }
 0x2c7   : > { %v1593_v40 = vpop.f32.mrb[53].mxu1 }
 0x2c8   : > { %v1594_v41 = vadd.f32 %v1593_v40, %v1592_v39  ;;  %v1595_v42 = vpop.f32.mrb[54].mxu1 }
 0x2c9   : > { %v1596_v43 = vpop.f32.mrb[55].mxu1 }
 0x2ca   : > { %v1235_v44 = vadd.f32 %v1594_v41, %v2285_v62  ;;  %v1597_v45 = vadd.f32 %v1596_v43, %v1595_v42 }
 0x2cc   : > { %1283 = vst [vmem:[%s2290_s28 + $0xd0] sm:$0xff] %v1235_v44  ;;  %v1238_v46 = vadd.f32 %v1597_v45, %v2285_v62 }
 0x2ce   : > { %1284 = vst [vmem:[%s2290_s28 + $0xd8] sm:$0xff] %v1238_v46  ;;  %v1598_v47 = vpop.f32.mrb[56].mxu1 }
 0x2cf   : > { %v1599_v48 = vpop.f32.mrb[57].mxu1 }
 0x2d0   : > { %v1600_v49 = vadd.f32 %v1599_v48, %v1598_v47  ;;  %v1601_v50 = vpop.f32.mrb[58].mxu1 }
 0x2d1   : > { %v1602_v51 = vpop.f32.mrb[59].mxu1 }
 0x2d2   : > { %v1243_v52 = vadd.f32 %v1600_v49, %v2285_v62  ;;  %v1603_v53 = vadd.f32 %v1602_v51, %v1601_v50 }
 0x2d4   : > { %1285 = vst [vmem:[%s2290_s28 + $0xe0] sm:$0xff] %v1243_v52  ;;  %v1246_v54 = vadd.f32 %v1603_v53, %v2285_v62 }
 0x2d6   : > { %1286 = vst [vmem:[%s2290_s28 + $0xe8] sm:$0xff] %v1246_v54  ;;  %v1604_v55 = vpop.f32.mrb[60].mxu1 }
 0x2d7   : > { %v1605_v56 = vpop.f32.mrb[61].mxu1 }
 0x2d8   : > { %v1606_v57 = vadd.f32 %v1605_v56, %v1604_v55  ;;  %v1607_v58 = vpop.f32.mrb[62].mxu1 }
 0x2d9   : > { %v1608_v59 = vpop.f32.mrb[63].mxu1 }
 0x2da   : > { %v1251_v60 = vadd.f32 %v1606_v57, %v2285_v62  ;;  %v1609_v61 = vadd.f32 %v1608_v59, %v1607_v58 }
 0x2dc   : > { %1287 = vst [vmem:[%s2290_s28 + $0xf0] sm:$0xff] %v1251_v60  ;;  %v1254_v21 = vadd.f32 %v1609_v61, %v2285_v62 }
 0x2de   : > { %1288 = vst [vmem:[%s2290_s28 + $0xf8] sm:$0xff] %v1254_v21 }
 0x2df   : > { %1894 = shalt.err (!%p1891_p7)
}
 0x2e0   : > { %s1895_s14 = scalar_lea.hbm %s2357_s12, 4096  ;;  %s1899_s15 = scalar_lea.hbm %s2410_s5, 16384 }
 0x2e1   : > { %p1896_p9 = scmp.ne.s32.totalorder %s2357_s12, %s1895_s14  ;;  %p1900_p5 = scmp.lt.u32.totalorder %s2357_s12, %s2410_s5 }
 0x2e2   : > { %p1901_p10 = scmp.lt.u32.totalorder %s1899_s15, %s1895_s14  ;;  %p1903_p2 = scmp.lt.u32.totalorder %s1895_s14, %s2357_s12 }
 0x2e3   : > { %p1897_p12 = pnand %p1896_p9, %p2111_p8 }
 0x2e4   : > { %p1902_p1 = por %p1901_p10, %p1900_p5 }
 0x2e5   : > { %p1898_p0 = pneg %p1897_p12 }
 0x2e6   : > { %p1904_p4 = por %p1903_p2, %p1902_p1 }
 0x2e8   : > { %p1905_p6 = pnand %p1904_p4, %p1898_p0 }
 0x2ea   : > { %1908 = shalt.err (!%p1905_p6)
}
 0x2eb   : > { %s1961_s13 = smov 128   ;;  %s1962_s11 = smov 8  }
 0x2ec   : > { %1620 = dma.vmem_to_hbm [thread:$0]  (%p2111_p8), %s2359_s17, 4096, %s2357_s12, %s1290_s22, %s1961_s13, %s1961_s13, %s1962_s11  }
 0x2ed PF: > { %p1642_p11 = scmp.ge.s32.totalorder %s1951_s21, 2  ;;  %s1318_s29 = sand.u32 1, %s1939_s18  }
 0x2ee   : > { %p2425_p13 = scmp.ne.s32.totalorder %s2415_s25, 0  ;;  %s1319_s30 = scalar_lea.sflag [#allocation4], %s1318_s29 }
 0x2f0   : > { %p1634_p3 = pnand %p1642_p11, %p2425_p13 }
 0x2f2   : > { %1934 = dma.done.wait (!%p1634_p3), %s1319_s30, 4096  }
 0x2f3   : > { %1936 = vsyncadd (!%p1634_p3), %s1319_s30, 4294963200  ;;  %p19_p7 = scmp.ge.s32.totalorder %s2098_s23, 6   ;;  %s2426_s18 = smov %s1943_s19 }
 0x2f4   : > { %s2427_s19 = smov %s1947_s20  ;;  %s2428_s20 = smov %s2107_s7 }
 0x2f5   : > { %s2429_s21 = smov %s2098_s23  ;;  %21 = sbr.rel (!%p19_p7) target bundleno = 6 (0x6), region = 93 }
 0x2fc   :  { %1324 = vsyncpa [#allocation3], 1 }
 0x2fd   :  { %1326 = vsyncpa [#allocation3 + $0x1], 1 }
 0x2fe   :  { %1327 = vsyncpa [#allocation6], 1 }
 0x2ff   :  { %1328 = vsyncpa [#allocation4], 1 }
 0x300   :  { %1330 = vsyncpa [#allocation4 + $0x1], 1 }

</bundles_post_ra>
